<compile_context>
chip_gen: v7x
topology: tpu7x:2x2x1
jax: 0.10.0
libtpu: 0.0.40
codegen_flags: <defaults>
</compile_context>

<pallas_src>
import functools
import math

import numpy as np
import jax
import jax.numpy as jnp
from jax.experimental import pallas as pl
from jax.experimental.pallas import tpu as pltpu

_VMEM_LIMIT = 32 * 1024 * 1024          # explicit scoped-VMEM limit (safe on v5e/v6e/v7x)
_TILE_VMEM_BUDGET = 12 * 1024 * 1024    # per-tile budget; x2 double-buffering stays < limit


def _pick_row_block(rows, bytes_per_row, *, max_block=512):
    """Largest legal row tile: full `rows` when small (a full-dim block is always
    legal), otherwise a multiple of 8 capped so double-buffered tiles fit VMEM."""
    if rows <= max_block:
        return rows
    by_vmem = _TILE_VMEM_BUDGET // max(1, 2 * bytes_per_row)
    blk = max(8, min(max_block, by_vmem))
    return (blk // 8) * 8


# ---------------------------------------------------------------------------
# Kernel 1: fused K / V projection.
# ---------------------------------------------------------------------------
def _kv_proj_kernel(*refs, has_bias):
    if has_bias:
        x_ref, wk_ref, wv_ref, bk_ref, bv_ref, k_ref, v_ref = refs
    else:
        x_ref, wk_ref, wv_ref, k_ref, v_ref = refs
    x = x_ref[...].astype(jnp.float32)                              # (bt, H)
    k = jnp.dot(x, wk_ref[...].astype(jnp.float32),
                preferred_element_type=jnp.float32)                 # (bt, A)
    v = jnp.dot(x, wv_ref[...].astype(jnp.float32),
                preferred_element_type=jnp.float32)
    if has_bias:
        k = k + bk_ref[...].astype(jnp.float32)
        v = v + bv_ref[...].astype(jnp.float32)
    k_ref[...] = k.astype(k_ref.dtype)
    v_ref[...] = v.astype(v_ref.dtype)


def _kv_projection(x, wk, wv, bk, bv):
    T, H = x.shape
    A = wk.shape[1]
    has_bias = bk is not None
    bt = _pick_row_block(T, 4 * (H + 2 * A))
    grid = (pl.cdiv(T, bt),)

    in_specs = [
        pl.BlockSpec((bt, H), lambda i: (i, 0)),
        pl.BlockSpec((H, A), lambda i: (0, 0)),
        pl.BlockSpec((H, A), lambda i: (0, 0)),
    ]
    args = [x, wk, wv]
    if has_bias:
        in_specs += [pl.BlockSpec((1, A), lambda i: (0, 0)),
                     pl.BlockSpec((1, A), lambda i: (0, 0))]
        args += [bk.reshape(1, A), bv.reshape(1, A)]

    cost = pl.CostEstimate(
        flops=4 * T * H * A,
        transcendentals=0,
        bytes_accessed=4 * (T * H + 2 * H * A + 2 * T * A),
    )
    k, v = pl.pallas_call(
        functools.partial(_kv_proj_kernel, has_bias=has_bias),
        out_shape=(jax.ShapeDtypeStruct((T, A), x.dtype),
                   jax.ShapeDtypeStruct((T, A), x.dtype)),
        grid_spec=pltpu.PrefetchScalarGridSpec(
            num_scalar_prefetch=0,
            grid=grid,
            in_specs=in_specs,
            out_specs=[pl.BlockSpec((bt, A), lambda i: (i, 0)),
                       pl.BlockSpec((bt, A), lambda i: (i, 0))],
        ),
        compiler_params=pltpu.CompilerParams(
            dimension_semantics=("parallel",),
            vmem_limit_bytes=_VMEM_LIMIT,
        ),
        cost_estimate=cost,
    )(*args)
    return k, v


# ---------------------------------------------------------------------------
# Kernel 2: per-head masked class attention (dense, matches the reference path).
# ---------------------------------------------------------------------------
def _class_attn_kernel(q_ref, k_ref, v_ref, mask_ref, o_ref, w_ref, *, scale):
    q = q_ref[0].astype(jnp.float32)                                # (Lq, hd)
    k = k_ref[0].astype(jnp.float32)                                # (S,  hd)
    v = v_ref[0].astype(jnp.float32)                                # (S,  hd)
    # q @ k^T via dot_general (contract last dims) -> (Lq, S)
    s = jax.lax.dot_general(q, k, (((1,), (1,)), ((), ())),
                            preferred_element_type=jnp.float32) * scale
    s = s + mask_ref[...].astype(jnp.float32)
    m = jnp.max(s, axis=-1, keepdims=True)
    p = jnp.exp(s - m)
    p = p / jnp.sum(p, axis=-1, keepdims=True)
    o = jnp.dot(p, v, preferred_element_type=jnp.float32)           # (Lq, hd)
    o_ref[0] = o.astype(o_ref.dtype)
    w_ref[0] = p.astype(w_ref.dtype)


def _masked_multihead_attention(q, k, v, mask):
    n_head, Lq, hd = q.shape
    S = k.shape[1]
    scale = 1.0 / math.sqrt(hd)
    cost = pl.CostEstimate(
        flops=n_head * (4 * Lq * S * hd + 6 * Lq * S),
        transcendentals=n_head * Lq * S,
        bytes_accessed=4 * (q.size + k.size + v.size + mask.size
                            + n_head * Lq * hd + n_head * Lq * S),
    )
    o, w = pl.pallas_call(
        functools.partial(_class_attn_kernel, scale=scale),
        out_shape=(jax.ShapeDtypeStruct((n_head, Lq, hd), q.dtype),
                   jax.ShapeDtypeStruct((n_head, Lq, S), jnp.float32)),
        grid_spec=pltpu.PrefetchScalarGridSpec(
            num_scalar_prefetch=0,
            grid=(n_head,),
            in_specs=[
                pl.BlockSpec((1, Lq, hd), lambda h: (h, 0, 0)),
                pl.BlockSpec((1, S, hd), lambda h: (h, 0, 0)),
                pl.BlockSpec((1, S, hd), lambda h: (h, 0, 0)),
                pl.BlockSpec((Lq, S), lambda h: (0, 0)),
            ],
            out_specs=[
                pl.BlockSpec((1, Lq, hd), lambda h: (h, 0, 0)),
                pl.BlockSpec((1, Lq, S), lambda h: (h, 0, 0)),
            ],
        ),
        compiler_params=pltpu.CompilerParams(
            dimension_semantics=("parallel",),
            vmem_limit_bytes=_VMEM_LIMIT,
        ),
        cost_estimate=cost,
    )(q, k, v, mask)
    return o, w


# ---------------------------------------------------------------------------
# Kernel 3: output projection.
# ---------------------------------------------------------------------------
def _linear_kernel(*refs, has_bias):
    if has_bias:
        x_ref, w_ref, b_ref, o_ref = refs
    else:
        x_ref, w_ref, o_ref = refs
    y = jnp.dot(x_ref[...].astype(jnp.float32), w_ref[...].astype(jnp.float32),
                preferred_element_type=jnp.float32)
    if has_bias:
        y = y + b_ref[...].astype(jnp.float32)
    o_ref[...] = y.astype(o_ref.dtype)


def _linear(x, w, b):
    R, A = x.shape
    H = w.shape[1]
    has_bias = b is not None
    br = _pick_row_block(R, 4 * (A + H))
    grid = (pl.cdiv(R, br),)

    in_specs = [pl.BlockSpec((br, A), lambda i: (i, 0)),
                pl.BlockSpec((A, H), lambda i: (0, 0))]
    args = [x, w]
    if has_bias:
        in_specs.append(pl.BlockSpec((1, H), lambda i: (0, 0)))
        args.append(b.reshape(1, H))

    cost = pl.CostEstimate(
        flops=2 * R * A * H,
        transcendentals=0,
        bytes_accessed=4 * (R * A + A * H + R * H),
    )
    return pl.pallas_call(
        functools.partial(_linear_kernel, has_bias=has_bias),
        out_shape=jax.ShapeDtypeStruct((R, H), x.dtype),
        grid_spec=pltpu.PrefetchScalarGridSpec(
            num_scalar_prefetch=0,
            grid=grid,
            in_specs=in_specs,
            out_specs=pl.BlockSpec((br, H), lambda i: (i, 0)),
        ),
        compiler_params=pltpu.CompilerParams(
            dimension_semantics=("parallel",),
            vmem_limit_bytes=_VMEM_LIMIT,
        ),
        cost_estimate=cost,
    )(*args)


# ---------------------------------------------------------------------------
# Block-diagonal mask (materialized, like BlockDiagonalMask.materialize()).
# ---------------------------------------------------------------------------
def _block_diag_mask(n_classes, kv_seqlens):
    B = len(kv_seqlens)
    q_seg = np.repeat(np.arange(B), n_classes)
    kv_seg = np.repeat(np.arange(B), np.asarray(kv_seqlens))
    m = np.where(q_seg[:, None] == kv_seg[None, :], 0.0, -np.inf).astype(np.float32)
    return jnp.asarray(m)                                           # (B*n_classes, T)


# ---------------------------------------------------------------------------
# Full ClassAttention forward.
# ---------------------------------------------------------------------------
def class_attention(features, class_tokens, wk, bk, wv, bv, wo, bo,
                    kv_seqlens, *, n_head):
    """features: (1, T, hidden_dim); class_tokens: (1, n_classes, attention_dim);
    kv_seqlens: static list of segment lengths (the BlockDiagonalMask equivalent).
    Returns (out (B, n_classes, hidden_dim), attn_weights (1, B*n_classes, T, n_head))."""
    _, T, H = features.shape
    A = wk.shape[1]
    n_classes = class_tokens.shape[1]
    hd = A // n_head
    B = len(kv_seqlens)
    Lq = B * n_classes

    # 1) K / V projections.
    x2 = features.reshape(T, H)
    K, V = _kv_projection(x2, wk, wv, bk, bv)

    # Head split: (T, A) -> (n_head, T, hd); class tokens tiled once per segment.
    k_h = jnp.transpose(K.reshape(T, n_head, hd), (1, 0, 2))
    v_h = jnp.transpose(V.reshape(T, n_head, hd), (1, 0, 2))
    q_h = jnp.transpose(
        jnp.tile(class_tokens.reshape(n_classes, n_head, hd), (B, 1, 1)), (1, 0, 2))

    # 2) Block-diagonal masked attention.
    mask = _block_diag_mask(n_classes, kv_seqlens)                  # (Lq, T)
    o_heads, w_heads = _masked_multihead_attention(q_h, k_h, v_h, mask)

    # 3) Merge heads + output projection.
    attn_out = jnp.transpose(o_heads, (1, 0, 2)).reshape(Lq, A)
    out = _linear(attn_out, wo, bo).reshape(B, n_classes, wo.shape[1])

    # attn_weights rearranged 'b h c n -> b c n h' like the reference.
    attn_weights = jnp.transpose(w_heads, (1, 2, 0))[None]          # (1, Lq, T, n_head)
    return out, attn_weights
    # TODO(synk): resid_dropout is declared in the module but never applied in its
    # forward(), so no dropout is implemented here.


if __name__ == "__main__":
    key = jax.random.PRNGKey(0)

    hidden_dim = 32
    attention_dim = 32
    n_head = 4
    n_classes = 3
    kv_seqlens = [7, 9]              # two packed sequences (BlockDiagonalMask)
    B = len(kv_seqlens)
    T = sum(kv_seqlens)
    hd = attention_dim // n_head

    ks = jax.random.split(key, 8)
    features = jax.random.normal(ks[0], (1, T, hidden_dim), dtype=jnp.float32)
    xavier = math.sqrt(2.0 / (n_classes + attention_dim))
    class_tokens = xavier * jax.random.normal(ks[1], (1, n_classes, attention_dim),
                                              dtype=jnp.float32)
    wk = 0.05 * jax.random.normal(ks[2], (hidden_dim, attention_dim), dtype=jnp.float32)
    wv = 0.05 * jax.random.normal(ks[3], (hidden_dim, attention_dim), dtype=jnp.float32)
    wo = 0.05 * jax.random.normal(ks[4], (attention_dim, hidden_dim), dtype=jnp.float32)
    bk = 0.01 * jax.random.normal(ks[5], (attention_dim,), dtype=jnp.float32)
    bv = 0.01 * jax.random.normal(ks[6], (attention_dim,), dtype=jnp.float32)
    bo = 0.01 * jax.random.normal(ks[7], (hidden_dim,), dtype=jnp.float32)

    out, attn_w = class_attention(features, class_tokens, wk, bk, wv, bv, wo, bo,
                                  kv_seqlens, n_head=n_head)
    jax.block_until_ready(out)
    jax.block_until_ready(attn_w)

    # ---- pure-JAX reference mirroring the PyTorch forward ----
    x2 = features.reshape(T, hidden_dim)
    K_ref = x2 @ wk + bk
    V_ref = x2 @ wv + bv
    k_r = jnp.transpose(K_ref.reshape(T, n_head, hd), (1, 0, 2))
    v_r = jnp.transpose(V_ref.reshape(T, n_head, hd), (1, 0, 2))
    q_r = jnp.transpose(
        jnp.tile(class_tokens.reshape(n_classes, n_head, hd), (B, 1, 1)), (1, 0, 2))
    mask_r = _block_diag_mask(n_classes, kv_seqlens)
    s = jnp.einsum('hqd,hkd->hqk', q_r, k_r) / math.sqrt(hd) + mask_r[None]
    p = jax.nn.softmax(s, axis=-1)
    o = jnp.einsum('hqk,hkd->hqd', p, v_r)
    o = jnp.transpose(o, (1, 0, 2)).reshape(B * n_classes, attention_dim)
    ref_out = (o @ wo + bo).reshape(B, n_classes, hidden_dim)
    ref_w = jnp.transpose(p, (1, 2, 0))[None]

    assert out.shape == (B, n_classes, hidden_dim)
    assert attn_w.shape == (1, B * n_classes, T, n_head)
    assert jnp.allclose(out, ref_out, atol=1e-4, rtol=1e-4), "output mismatch vs reference"
    assert jnp.allclose(attn_w, ref_w, atol=1e-4, rtol=1e-4), "attn weights mismatch vs reference"

    print("KERNEL_OK")
</pallas_src>

<mosaic_0001>
module attributes {stable_mosaic.version = 11 : i64} {
  func.func @_kv_proj_kernel(%arg0: i32, %arg1: memref<16x32xf32, #tpu.memory_space<vmem>>, %arg2: memref<32x32xf32, #tpu.memory_space<vmem>>, %arg3: memref<32x32xf32, #tpu.memory_space<vmem>>, %arg4: memref<1x32xf32, #tpu.memory_space<vmem>>, %arg5: memref<1x32xf32, #tpu.memory_space<vmem>>, %arg6: memref<16x32xf32, #tpu.memory_space<vmem>>, %arg7: memref<16x32xf32, #tpu.memory_space<vmem>>) attributes {dimension_semantics = [#tpu.dimension_semantics<parallel>], iteration_bounds = array<i64: 1>, scalar_prefetch = 0 : i64, scratch_operands = 0 : i64, tpu.core_type = #tpu.core_type<tc>, window_params = [{transform_indices = @transform_0, window_bounds = array<i64: 16, 32>}, {pipeline_mode = #tpu.pipeline_mode<synchronous>, transform_indices = @transform_1, window_bounds = array<i64: 32, 32>}, {pipeline_mode = #tpu.pipeline_mode<synchronous>, transform_indices = @transform_2, window_bounds = array<i64: 32, 32>}, {pipeline_mode = #tpu.pipeline_mode<synchronous>, transform_indices = @transform_3, window_bounds = array<i64: 1, 32>}, {pipeline_mode = #tpu.pipeline_mode<synchronous>, transform_indices = @transform_4, window_bounds = array<i64: 1, 32>}, {transform_indices = @transform_5, window_bounds = array<i64: 16, 32>}, {transform_indices = @transform_6, window_bounds = array<i64: 16, 32>}]} {
    %c0 = arith.constant 0 : index
    %c0_0 = arith.constant 0 : index
    %0 = vector.load %arg1[%c0, %c0_0] : memref<16x32xf32, #tpu.memory_space<vmem>>, vector<16x32xf32>
    %c0_1 = arith.constant 0 : index
    %c0_2 = arith.constant 0 : index
    %1 = vector.load %arg2[%c0_1, %c0_2] : memref<32x32xf32, #tpu.memory_space<vmem>>, vector<32x32xf32>
    %cst = arith.constant dense<0.000000e+00> : vector<16x32xf32>
    %2 = tpu.matmul %0, %1, %cst {dimension_numbers = #tpu.dot_dimension_numbers<[1], [0], [0], [1], [0, 0, 1, 1], [], []>} : vector<16x32xf32>, vector<32x32xf32>, vector<16x32xf32> -> vector<16x32xf32>
    %c0_3 = arith.constant 0 : index
    %c0_4 = arith.constant 0 : index
    %3 = vector.load %arg3[%c0_3, %c0_4] : memref<32x32xf32, #tpu.memory_space<vmem>>, vector<32x32xf32>
    %cst_5 = arith.constant dense<0.000000e+00> : vector<16x32xf32>
    %4 = tpu.matmul %0, %3, %cst_5 {dimension_numbers = #tpu.dot_dimension_numbers<[1], [0], [0], [1], [0, 0, 1, 1], [], []>} : vector<16x32xf32>, vector<32x32xf32>, vector<16x32xf32> -> vector<16x32xf32>
    %c0_6 = arith.constant 0 : index
    %c0_7 = arith.constant 0 : index
    %5 = vector.load %arg4[%c0_6, %c0_7] : memref<1x32xf32, #tpu.memory_space<vmem>>, vector<1x32xf32>
    %6 = vector.broadcast %5 : vector<1x32xf32> to vector<16x32xf32>
    %7 = arith.addf %2, %6 : vector<16x32xf32>
    %c0_8 = arith.constant 0 : index
    %c0_9 = arith.constant 0 : index
    %8 = vector.load %arg5[%c0_8, %c0_9] : memref<1x32xf32, #tpu.memory_space<vmem>>, vector<1x32xf32>
    %9 = vector.broadcast %8 : vector<1x32xf32> to vector<16x32xf32>
    %10 = arith.addf %4, %9 : vector<16x32xf32>
    %c0_10 = arith.constant 0 : index
    %c0_11 = arith.constant 0 : index
    %11 = vector.load %arg6[%c0_10, %c0_11] : memref<16x32xf32, #tpu.memory_space<vmem>>, vector<16x32xf32>
    tpu.vector_store %arg6[%c0_10, %c0_11], %7 {strides = array<i32>} : memref<16x32xf32, #tpu.memory_space<vmem>>, vector<16x32xf32>,
    %c0_12 = arith.constant 0 : index
    %c0_13 = arith.constant 0 : index
    %12 = vector.load %arg7[%c0_12, %c0_13] : memref<16x32xf32, #tpu.memory_space<vmem>>, vector<16x32xf32>
    tpu.vector_store %arg7[%c0_12, %c0_13], %10 {strides = array<i32>} : memref<16x32xf32, #tpu.memory_space<vmem>>, vector<16x32xf32>,
    return
  }
  func.func @transform_0(%arg0: i32) -> (i32, i32) {
    %c0_i32 = arith.constant 0 : i32
    %c0_i32_0 = arith.constant 0 : i32
    return %arg0, %c0_i32 : i32, i32
  }
  func.func @transform_1(%arg0: i32) -> (i32, i32) {
    %c0_i32 = arith.constant 0 : i32
    %c0_i32_0 = arith.constant 0 : i32
    %c0_i32_1 = arith.constant 0 : i32
    return %c0_i32, %c0_i32_0 : i32, i32
  }
  func.func @transform_2(%arg0: i32) -> (i32, i32) {
    %c0_i32 = arith.constant 0 : i32
    %c0_i32_0 = arith.constant 0 : i32
    %c0_i32_1 = arith.constant 0 : i32
    return %c0_i32, %c0_i32_0 : i32, i32
  }
  func.func @transform_3(%arg0: i32) -> (i32, i32) {
    %c0_i32 = arith.constant 0 : i32
    %c0_i32_0 = arith.constant 0 : i32
    %c0_i32_1 = arith.constant 0 : i32
    return %c0_i32, %c0_i32_0 : i32, i32
  }
  func.func @transform_4(%arg0: i32) -> (i32, i32) {
    %c0_i32 = arith.constant 0 : i32
    %c0_i32_0 = arith.constant 0 : i32
    %c0_i32_1 = arith.constant 0 : i32
    return %c0_i32, %c0_i32_0 : i32, i32
  }
  func.func @transform_5(%arg0: i32) -> (i32, i32) {
    %c0_i32 = arith.constant 0 : i32
    %c0_i32_0 = arith.constant 0 : i32
    return %arg0, %c0_i32 : i32, i32
  }
  func.func @transform_6(%arg0: i32) -> (i32, i32) {
    %c0_i32 = arith.constant 0 : i32
    %c0_i32_0 = arith.constant 0 : i32
    return %arg0, %c0_i32 : i32, i32
  }
}

</mosaic_0001>

<bundles_post_ra>
// kernel: tpu_custom_call.1
= control target key start
LH: loop header
LB: loop body
LE: loop exit
PB: predicated region body
PF: predicated region fallthrough
CT: control target
= control target key end

     0   :  { %12 = vsyncpa [#allocation3], 0  ;;  %s610_s0 = inlined_call_operand.hbm [shape: f32[16,32], index: 0, kind: input, shape index: {}]   ;;  %s611_s1 = inlined_call_operand.hbm [shape: f32[32,32], index: 1, kind: input, shape index: {}]   ;;  %s612_s2 = inlined_call_operand.hbm [shape: f32[32,32], index: 2, kind: input, shape index: {}]   ;;  %s613_s3 = inlined_call_operand.vmem [shape: f32[1,32], index: 3, kind: input, shape index: {}]   ;;  %s614_s4 = inlined_call_operand.vmem [shape: f32[1,32], index: 4, kind: input, shape index: {}]   ;;  %s615_s5 = inlined_call_operand.hbm [shape: f32[16,32], index: 5, kind: output, shape index: {0}]   ;;  %s616_s6 = inlined_call_operand.hbm [shape: f32[16,32], index: 6, kind: output, shape index: {1}]  }
   0x1   :  { %13 = vsyncpa [#allocation6], 0 }
   0x2   :  { %14 = vsyncpa [#allocation4], 0 }
   0x3   :  { %15 = vsyncpa [#allocation10], 0  ;;  %s465_s21 = smov [#allocation5]   ;;  %s466_s23 = smov [#allocation2]  }
   0x4   :  { %s33_s22 = sshll.u32 %s465_s21, 4  ;;  %s21_s24 = sshll.u32 %s466_s23, 4  ;;  %s34_s22 = int_to_ptr.vmem [resolvable:$true] %s33_s22  ;;  %s507_s24 = int_to_ptr.vmem [resolvable:$true] %s21_s24 }
   0x5   :  { %s347_s27 = scalar_lea.hbm %s611_s1, 512 }
   0x6   :  { %p348_p0 = scmp.ne.s32.totalorder %s611_s1, %s347_s27  ;;  %p351_p1 = scmp.lt.u32.totalorder %s347_s27, %s611_s1 }
   0x8   :  { %p353_p2 = pnand %p351_p1, %p348_p0 }
   0xa   :  { %356 = shalt.err (!%p353_p2)
}
   0xb   :  { %s357_s8 = scalar_lea.vmem %s34_s22, 512  ;;  %p362_p4 = scmp.lt.s32.totalorder %s34_s22, %s34_s22 }
   0xc   :  { %p358_p3 = scmp.ne.s32.totalorder %s34_s22, %s357_s8  ;;  %p363_p5 = scmp.lt.s32.totalorder %s357_s8, %s357_s8 }
   0xe   :  { %p364_p6 = por %p363_p5, %p362_p4 }
  0x10   :  { %p365_p7 = pnand %p364_p6, %p358_p3 }
  0x12   :  { %368 = shalt.err (!%p365_p7)
}
  0x13   :  { %s467_s9 = smov 128   ;;  %s468_s10 = smov 8  }
  0x14   :  { %39 = dma.hbm_to_vmem [thread:$0]  %s611_s1, 512, %s34_s22, [#allocation6], %s467_s9, %s467_s9, %s468_s10  }
  0x15   :  { %s369_s15 = scalar_lea.hbm %s610_s0, 256 }
  0x16   :  { %p370_p8 = scmp.ne.s32.totalorder %s610_s0, %s369_s15  ;;  %p373_p9 = scmp.lt.u32.totalorder %s369_s15, %s610_s0 }
  0x18   :  { %p375_p10 = pnand %p373_p9, %p370_p8 }
  0x1a   :  { %378 = shalt.err (!%p375_p10)
}
  0x1b   :  { %s379_s20 = scalar_lea.vmem %s507_s24, 256  ;;  %p384_p12 = scmp.lt.s32.totalorder %s507_s24, %s507_s24 }
  0x1c   :  { %p380_p11 = scmp.ne.s32.totalorder %s507_s24, %s379_s20  ;;  %p385_p13 = scmp.lt.s32.totalorder %s379_s20, %s379_s20 }
  0x1e   :  { %p386_p0 = por %p385_p13, %p384_p12 }
  0x20   :  { %p387_p1 = pnand %p386_p0, %p380_p11 }
  0x22   :  { %390 = shalt.err (!%p387_p1)
}
  0x23   :  { %27 = dma.hbm_to_vmem [thread:$0]  %s610_s0, 256, %s507_s24, [#allocation3], %s467_s9, %s467_s9, %s468_s10  }
  0x24   :  { %s469_s22 = smov [#allocation7]   ;;  %s391_s27 = scalar_lea.hbm %s612_s2, 512 }
  0x25   :  { %s45_s23 = sshll.u32 %s469_s22, 4  ;;  %p392_p2 = scmp.ne.s32.totalorder %s612_s2, %s391_s27  ;;  %s46_s23 = int_to_ptr.vmem [resolvable:$true] %s45_s23 }
  0x26   :  { %p395_p3 = scmp.lt.u32.totalorder %s391_s27, %s612_s2 }
  0x28   :  { %p397_p4 = pnand %p395_p3, %p392_p2 }
  0x2a   :  { %400 = shalt.err (!%p397_p4)
}
  0x2b   :  { %s401_s8 = scalar_lea.vmem %s46_s23, 512  ;;  %p406_p6 = scmp.lt.s32.totalorder %s46_s23, %s46_s23 }
  0x2c   :  { %p402_p5 = scmp.ne.s32.totalorder %s46_s23, %s401_s8  ;;  %p407_p7 = scmp.lt.s32.totalorder %s401_s8, %s401_s8 }
  0x2e   :  { %p408_p8 = por %p407_p7, %p406_p6 }
  0x30   :  { %p409_p9 = pnand %p408_p8, %p402_p5 }
  0x32   :  { %412 = shalt.err (!%p409_p9)
}
  0x33   :  { %51 = dma.hbm_to_vmem [thread:$0]  %s612_s2, 512, %s46_s23, [#allocation6], %s467_s9, %s467_s9, %s468_s10  }
  0x34   :  { %457 = dma.done.wait [#allocation3], 256  }
  0x35   :  { %458 = vsyncadd [#allocation3], 4294967040 }
  0x36   :  { %459 = dma.done.wait [#allocation6], 1024  }
  0x37   :  { %460 = vsyncadd [#allocation6], 4294966272  ;;  %v67_v0 = vld [vmem:[#allocation5] sm:$0xff]  ;;  %v68_v1 = vld [vmem:[#allocation5 + $0x8] sm:$0xff]  ;;  %vm82_vm0 = vcmask 261120   ;;  %s470_s14 = smov [#allocation8]  }
  0x38   :  { %v71_v2 = vld [vmem:[#allocation7] sm:$0xff]  ;;  %v324_v3 = vpack.c.bf16 %v68_v1, %v67_v0  ;;  %v72_v4 = vld [vmem:[#allocation7 + $0x8] sm:$0xff]  ;;  %v69_v5 = vld [vmem:[#allocation5 + $0x10] sm:$0xff]  ;;  %s255_s15 = sshll.u32 %s470_s14, 4  ;;  %s471_s16 = smov [#allocation9]   ;;  %s256_s15 = int_to_ptr.vmem [resolvable:$true] %s255_s15 }
  0x39   :  { %v70_v6 = vld [vmem:[#allocation5 + $0x18] sm:$0xff]  ;;  %v332_v7 = vpack.c.bf16 %v72_v4, %v71_v2  ;;  %v73_v9 = vld [vmem:[#allocation7 + $0x10] sm:$0xff]  ;;  %s267_s17 = sshll.u32 %s471_s16, 4  ;;  %p418_p11 = scmp.lt.s32.totalorder %s256_s15, %s256_s15  ;;  %s570_s17 = int_to_ptr.vmem [resolvable:$true] %s267_s17 }
  0x3a   :  { %v328_v8 = vpack.c.bf16 %v70_v6, %v69_v5  ;;  %v74_v10 = vld [vmem:[#allocation7 + $0x18] sm:$0xff]  ;;  %v65_v11 = vld [vmem:[#allocation2] sm:$0xff]  ;;  %325 = vmatprep.subr.bf16.mxu0 %v324_v3 }
  0x3b   :  { %v336_v12 = vpack.c.bf16 %v74_v10, %v73_v9  ;;  %310 = vmatprep.mubr.msk.f32.mxu0 %vm82_vm0, %v65_v11  ;;  %333 = vmatprep.subr.bf16.mxu1 %v332_v7  ;;  %v66_v13 = vld [vmem:[#allocation2 + $0x8] sm:$0xff]  ;;  %v284_v14 = vld [vmem:[%s613_s3] ss:$0 sm:$0xff]  ;;  %s413_s3 = scalar_lea.vmem %s256_s15, 256 }
  0x3c   :  { %327 = vmatpush3.bf16.msra.mxu0 %v324_v3  ;;  %335 = vmatpush3.bf16.msra.mxu1 %v332_v7  ;;  %v287_v15 = vld [vmem:[%s614_s4] ss:$0 sm:$0xff]  ;;  %p414_p10 = scmp.ne.s32.totalorder %s256_s15, %s413_s3  ;;  %p419_p12 = scmp.lt.s32.totalorder %s413_s3, %s413_s3 }
  0x3d   :  { %329 = vmatprep.subr.bf16.mxu0 %v328_v8  ;;  %337 = vmatprep.subr.bf16.mxu1 %v336_v12 }
  0x3e   :  { %321 = vmatprep.mubr.msk.f32.mxu1 %vm82_vm0, %v65_v11  ;;  %p420_p13 = por %p419_p12, %p418_p11 }
  0x40   :  { %331 = vmatpush3.bf16.msra.mxu0 %v328_v8  ;;  %339 = vmatpush3.bf16.msra.mxu1 %v336_v12  ;;  %p421_p0 = pnand %p420_p13, %p414_p10 }
  0x43   :  { %311 = vmatmul.mubr.msk.f32.vlgmr.msra.gmra.mrb[0].mxu0 %vm82_vm0, %v66_v13  ;;  %322 = vmatmul.mubr.msk.f32.vlgmr.msra.gmra.mrb[0].mxu1 %vm82_vm0, %v66_v13 }
 0x116   :  { %v312_v16 = vpop.f32.mrb[0].mxu0  ;;  %v323_v18 = vpop.f32.mrb[0].mxu1 }
 0x117   :  { %v161_v17 = vadd.f32 %v312_v16, %v284_v14  ;;  %v155_v19 = vpop.f32.mrb[1].mxu0  ;;  %v243_v20 = vadd.f32 %v323_v18, %v287_v15  ;;  %v237_v22 = vpop.f32.mrb[1].mxu1 }
 0x118   :  { %v156_v21 = vadd.f32 %v284_v14, %v155_v19  ;;  %v238_v23 = vadd.f32 %v287_v15, %v237_v22 }
 0x119   :  { %247 = vst.msk [vmem:[#allocation8 + $0x8] sm:$0xff] %vm82_vm0, %v161_v17  ;;  %249 = vst.msk [vmem:[#allocation9 + $0x8] sm:$0xff] %vm82_vm0, %v243_v20 }
 0x11a   :  { %246 = vst.msk [vmem:[#allocation8] sm:$0xff] %vm82_vm0, %v156_v21  ;;  %248 = vst.msk [vmem:[#allocation9] sm:$0xff] %vm82_vm0, %v238_v23 }
 0x11b   :  { %424 = shalt.err (!%p421_p0)
}
 0x11c   :  { %s425_s19 = scalar_lea.hbm %s615_s5, 256 }
 0x11d   :  { %p426_p1 = scmp.ne.s32.totalorder %s615_s5, %s425_s19  ;;  %p429_p2 = scmp.lt.u32.totalorder %s425_s19, %s615_s5 }
 0x11f   :  { %p431_p3 = pnand %p429_p2, %p426_p1 }
 0x121   :  { %434 = shalt.err (!%p431_p3)
}
 0x122   :  { %261 = dma.vmem_to_hbm [thread:$0]  %s256_s15, 256, %s615_s5, [#allocation4], %s467_s9, %s467_s9, %s468_s10  }
 0x123   :  { %s435_s26 = scalar_lea.vmem %s570_s17, 256  ;;  %p440_p5 = scmp.lt.s32.totalorder %s570_s17, %s570_s17 }
 0x124   :  { %p436_p4 = scmp.ne.s32.totalorder %s570_s17, %s435_s26  ;;  %p441_p6 = scmp.lt.s32.totalorder %s435_s26, %s435_s26 }
 0x126   :  { %p442_p7 = por %p441_p6, %p440_p5 }
 0x128   :  { %p443_p8 = pnand %p442_p7, %p436_p4 }
 0x12a   :  { %446 = shalt.err (!%p443_p8)
}
 0x12b   :  { %s447_s29 = scalar_lea.hbm %s616_s6, 256 }
 0x12c   :  { %p448_p9 = scmp.ne.s32.totalorder %s616_s6, %s447_s29  ;;  %p451_p10 = scmp.lt.u32.totalorder %s447_s29, %s616_s6 }
 0x12e   :  { %p453_p11 = pnand %p451_p10, %p448_p9 }
 0x130   :  { %456 = shalt.err (!%p453_p11)
}
 0x131   :  { %273 = dma.vmem_to_hbm [thread:$0]  %s570_s17, 256, %s616_s6, [#allocation10], %s467_s9, %s467_s9, %s468_s10  }
 0x132   :  { %461 = dma.done.wait [#allocation4], 256  }
 0x133   :  { %462 = vsyncadd [#allocation4], 4294967040 }
 0x134   :  { %463 = dma.done.wait [#allocation10], 256  }
 0x135   :  { %464 = vsyncadd [#allocation10], 4294967040 }
 0x136   :  { %280 = vsyncpa [#allocation3], 1 }
 0x137   :  { %281 = vsyncpa [#allocation6], 1 }
 0x138   :  { %282 = vsyncpa [#allocation4], 1 }
 0x139   :  { %283 = vsyncpa [#allocation10], 1 }

</bundles_post_ra>
